<compile_context>
chip_gen: v6e
topology: v6e:2x2x1
jax: 0.10.0
libtpu: 0.0.40
codegen_flags: <defaults>
</compile_context>

<pallas_src>
import math
from functools import partial

import jax
import jax.numpy as jnp
from jax.experimental import pallas as pl
from jax.experimental.pallas import tpu as pltpu

LANE = 128
SUBLANE = 8


def _round_up(x, m):
    return (x + m - 1) // m * m


def _gelu_exact(x):
    # matches torch.nn.functional.gelu default (erf-based, not tanh approx)
    return 0.5 * x * (1.0 + jax.lax.erf(x * (1.0 / math.sqrt(2.0))))


def _gelu_tanh(x):
    # EUP tanh path (approximate); NOT bit-matching torch's erf default.
    c = math.sqrt(2.0 / math.pi)
    return 0.5 * x * (1.0 + jnp.tanh(c * (x + 0.044715 * (x * x * x))))


def _feedforward_kernel(x_ref, halo_ref, w1_ref, dw_ref, w2_ref, o_ref,
                        h1_ref, *, gelu):
    # x_ref:    (1, TH, W, C)      current H-tile of the input
    # halo_ref: (1, 1, 2, W, C)    row above / row below this tile (zeros at border)
    # w1_ref:   (C, Chp)           1x1 conv #1 (hidden padded to lane multiple)
    # dw_ref:   (3, 3, Chp)        depthwise 3x3 weights
    # w2_ref:   (Chp, C)           1x1 conv #2
    # o_ref:    (1, TH, W, C)
    # h1_ref:   (TH+2, W, Chp) f32 scratch: GELU(conv1(x)) of tile + halo rows
    _, TH, W, C = x_ref.shape
    Chp = w1_ref.shape[1]

    # --- 1x1 pointwise conv (no bias) + GELU, straight into the h1 scratch ---
    # Tile and halo rows are processed separately so the MXU is fed directly
    # from the pipelined input buffers (no VMEM->VMEM assembly copy).
    body = jnp.dot(x_ref[0].reshape(TH * W, C), w1_ref[...],
                   preferred_element_type=jnp.float32)          # (TH*W, Chp)
    h1_ref[1:TH + 1] = gelu(body).reshape(TH, W, Chp)

    halo = jnp.dot(halo_ref[0, 0].reshape(2 * W, C), w1_ref[...],
                   preferred_element_type=jnp.float32)          # (2*W, Chp)
    halo = gelu(halo).reshape(2, W, Chp)
    h1_ref[0:1] = halo[0:1]                                     # top halo row
    h1_ref[TH + 1:TH + 2] = halo[1:2]                           # bottom halo row

    # --- depthwise 3x3, stride 1, zero padding 1 (vertical-first) ------------
    # Column partial sums over ky via leading-axis slices (free), then the two
    # horizontal taps via XLU roll + border mask on the (TH,W,Chp) partials.
    dwf = dw_ref[...].astype(jnp.float32)                       # (3, 3, Chp)

    def col_sum(kx):
        s = h1_ref[0:TH] * dwf[0, kx]
        s = s + h1_ref[1:TH + 1] * dwf[1, kx]
        s = s + h1_ref[2:TH + 2] * dwf[2, kx]
        return s                                                # (TH, W, Chp)

    col = jax.lax.broadcasted_iota(jnp.int32, (1, W, 1), 1)
    zero = jnp.float32(0.0)
    acc = col_sum(1)                                            # centre column
    acc = acc + jnp.where(col == 0, zero, pltpu.roll(col_sum(0), 1, 1))
    acc = acc + jnp.where(col == W - 1, zero, pltpu.roll(col_sum(2), W - 1, 1))
    h2 = gelu(acc)

    # --- final 1x1 pointwise conv back to C channels --------------------------
    out = jnp.dot(h2.reshape(TH * W, Chp).astype(w2_ref.dtype), w2_ref[...],
                  preferred_element_type=jnp.float32)           # (TH*W, C)
    o_ref[0] = out.reshape(TH, W, C).astype(o_ref.dtype)


def _tpu_vmem_bytes():
    # Per-generation physical VMEM; fall back to 128 MiB (v5e/v6e) if the
    # query is unavailable in this jax version.
    try:
        info = pltpu.get_tpu_info()
        cap = getattr(info, "vmem_capacity_bytes", None)
        if cap:
            return int(cap)
    except Exception:
        pass
    return 128 << 20


def _pick_tile_h(B, H, Wp, C, Chp, itemsize, budget_bytes, min_steps=8):
    """Largest TH (preferably a multiple of 8) whose tile fits the VMEM budget,
    softly preferring enough grid steps (B*nH >= min_steps) for v7x's 2 TCs."""
    cpad = _round_up(C, LANE)

    def vmem_need(th):
        # f32 h1 scratch + ~3 live f32 (th,W,Chp) depthwise partials/acc,
        # plus double-buffered (lane-padded) input tile + halo + output tile.
        interm = ((th + 2) + 3 * th) * Wp * Chp * 4
        io = 2 * (((th + 2) * Wp) + th * Wp) * cpad * itemsize
        return interm + io

    cands = ({th for th in range(8, H + 1, 8)} |
             {th for th in range(1, H + 1) if H % th == 0})
    cands = sorted(cands, reverse=True)
    fitting = [th for th in cands if vmem_need(th) <= budget_bytes]
    if not fitting:
        return cands[-1]
    for th in fitting:
        if B * ((H + th - 1) // th) >= min_steps:
            return th
    return fitting[0]


def feed_forward(x, w1, dw, w2, *, tile_h=None, approximate_gelu=False):
    """x: [B, H, W, C] (NHWC). w1: (C, Ch), dw: (3, 3, Ch), w2: (Ch, C).

    Note: the zero-row/column halo & padding scheme is exact ONLY because
    conv1 has no bias and GELU(0) == 0 (the PyTorch module is bias-free)."""
    B, H, W, C = x.shape
    Ch = w1.shape[1]
    assert w1.shape == (C, Ch) and dw.shape == (3, 3, Ch) and w2.shape == (Ch, C)

    gelu = _gelu_tanh if approximate_gelu else _gelu_exact

    # Pad hidden (lane) axis to a multiple of 128: exact (GELU(0)=0, padded
    # w2 rows are zero) and makes matmuls / elementwise chain lane-dense.
    Chp = _round_up(Ch, LANE)
    if Chp != Ch:
        w1 = jnp.pad(w1, ((0, 0), (0, Chp - Ch)))
        dw = jnp.pad(dw, ((0, 0), (0, 0), (0, Chp - Ch)))
        w2 = jnp.pad(w2, ((0, Chp - Ch), (0, 0)))

    # Pad W to a sublane multiple so the reshapes feeding/draining the MXU are
    # layout-free; zero columns are an exact stand-in for the border padding.
    Wp = _round_up(W, SUBLANE)
    if Wp != W:
        x = jnp.concatenate(
            [x, jnp.zeros((B, H, Wp - W, C), x.dtype)], axis=2)

    itemsize = x.dtype.itemsize
    w_itemsize = w1.dtype.itemsize
    cpad = _round_up(C, LANE)

    # Generation-aware VMEM budgets (v7x: 64 MiB phys -> ~48 MiB cap;
    # v5e/v6e: 128 MiB phys -> up to ~96 MiB; tile budget ~40% of physical).
    phys = _tpu_vmem_bytes()
    vmem_cap = min(phys * 3 // 4, 96 << 20)
    tile_budget = min(phys * 2 // 5, 48 << 20)

    if tile_h is None:
        tile_h = _pick_tile_h(B, H, Wp, C, Chp, itemsize, tile_budget)
    TH = int(tile_h)
    nH = pl.cdiv(H, TH)
    Hp = nH * TH
    if Hp != H:
        # zero rows below the image: exact (bias-free conv1, GELU(0)=0);
        # the extra output rows are sliced away below.
        x = jnp.concatenate(
            [x, jnp.zeros((B, Hp - H, Wp, C), x.dtype)], axis=1)

    # Halo rows per H-tile (row directly above / below, zeros at the border),
    # built from strided slices -- no full-image jnp.pad copy in HBM.
    zrow = jnp.zeros((B, 1, Wp, C), x.dtype)
    top = jnp.concatenate([zrow, x[:, TH - 1::TH][:, :nH - 1]], axis=1)
    bot = jnp.concatenate([x[:, TH::TH], zrow], axis=1)
    halo = jnp.stack([top, bot], axis=2)                         # (B,nH,2,Wp,C)

    # VMEM budget with lane/sublane-padded widths for the C-minor buffers.
    interm = ((TH + 2) + 3 * TH) * Wp * Chp * 4
    io = 2 * (((TH + 2) * Wp) + TH * Wp) * cpad * itemsize
    wts = 2 * (_round_up(C, SUBLANE) * Chp + SUBLANE * 3 * Chp
               + Chp * cpad) * w_itemsize
    need = interm + io + wts + (4 << 20)
    vmem_limit = int(min(max(need, 32 << 20), vmem_cap))

    flops = int(4 * B * H * W * C * Ch + 18 * B * H * W * Ch)
    transcendentals = int(2 * B * H * W * Ch)
    bytes_accessed = int(2 * x.size * itemsize + halo.size * itemsize
                         + (w1.size + dw.size + w2.size) * w_itemsize)

    grid_spec = pltpu.PrefetchScalarGridSpec(
        num_scalar_prefetch=0,
        grid=(B, nH),
        in_specs=[
            pl.BlockSpec((1, TH, Wp, C), lambda b, i: (b, i, 0, 0)),
            pl.BlockSpec((1, 1, 2, Wp, C), lambda b, i: (b, i, 0, 0, 0)),
            pl.BlockSpec((C, Chp), lambda b, i: (0, 0)),         # resident
            pl.BlockSpec((3, 3, Chp), lambda b, i: (0, 0, 0)),   # resident
            pl.BlockSpec((Chp, C), lambda b, i: (0, 0)),         # resident
        ],
        out_specs=pl.BlockSpec((1, TH, Wp, C), lambda b, i: (b, i, 0, 0)),
        scratch_shapes=[pltpu.VMEM((TH + 2, Wp, Chp), jnp.float32)],
    )

    out = pl.pallas_call(
        partial(_feedforward_kernel, gelu=gelu),
        out_shape=jax.ShapeDtypeStruct((B, Hp, Wp, C), x.dtype),
        grid_spec=grid_spec,
        compiler_params=pltpu.CompilerParams(
            dimension_semantics=("parallel", "parallel"),
            vmem_limit_bytes=vmem_limit),
        cost_estimate=pl.CostEstimate(
            flops=flops,
            transcendentals=transcendentals,
            bytes_accessed=bytes_accessed),
    )(x, halo, w1, dw, w2)

    if Hp != H or Wp != W:
        out = out[:, :H, :W]
    return out


def _feed_forward_ref(x, w1, dw, w2):
    # pure-JAX reference for tolerance checking (erf GELU, like torch default)
    B, H, W, C = x.shape
    h1 = _gelu_exact(jnp.einsum('bhwc,cd->bhwd', x, w1))
    h1p = jnp.pad(h1, ((0, 0), (1, 1), (1, 1), (0, 0)))
    acc = jnp.zeros_like(h1)
    for dy in range(3):
        for dx in range(3):
            acc = acc + h1p[:, dy:dy + H, dx:dx + W, :] * dw[dy, dx]
    h2 = _gelu_exact(acc)
    return jnp.einsum('bhwd,dc->bhwc', h2, w2).astype(x.dtype)


if __name__ == "__main__":
    # small shapes consistent with the module: dim=4, mult=4 -> hidden=16
    B, H, W, dim, mult = 2, 16, 16, 4, 4
    Ch = dim * mult

    key = jax.random.PRNGKey(0)
    kx, k1, k2, k3 = jax.random.split(key, 4)

    x = jax.random.normal(kx, (B, H, W, dim), dtype=jnp.float32)

    # PyTorch conv weight shapes noted:
    #   conv1 weight (Ch, dim, 1, 1)        -> stored here as (dim, Ch)
    #   depthwise conv weight (Ch, 1, 3, 3) -> stored here as (3, 3, Ch)
    #   conv2 weight (dim, Ch, 1, 1)        -> stored here as (Ch, dim)
    w1 = jax.random.normal(k1, (dim, Ch), jnp.float32) * (1.0 / math.sqrt(dim))
    dw = jax.random.normal(k2, (3, 3, Ch), jnp.float32) * (1.0 / 3.0)
    w2 = jax.random.normal(k3, (Ch, dim), jnp.float32) * (1.0 / math.sqrt(Ch))

    # Test 1: auto TH selection (multiple H-tiles -> exercises the halo path).
    out = feed_forward(x, w1, dw, w2)
    jax.block_until_ready(out)
    ref = _feed_forward_ref(x, w1, dw, w2)
    assert out.shape == (B, H, W, dim) and out.dtype == x.dtype
    err = float(jnp.max(jnp.abs(out - ref)))
    assert err < 1e-4, f"max abs err {err}"

    # Test 2: H not divisible by the tile -> exercises the padded-last-tile
    # path (no divisor-of-H restriction anymore).
    x2 = jax.random.normal(kx, (1, 10, W, dim), dtype=jnp.float32)
    out2 = feed_forward(x2, w1, dw, w2, tile_h=8)
    jax.block_until_ready(out2)
    ref2 = _feed_forward_ref(x2, w1, dw, w2)
    assert out2.shape == (1, 10, W, dim) and out2.dtype == x2.dtype
    err2 = float(jnp.max(jnp.abs(out2 - ref2)))
    assert err2 < 1e-4, f"max abs err {err2}"

    print("KERNEL_OK")
</pallas_src>

<mosaic_0001>
module attributes {stable_mosaic.version = 11 : i64} {
  func.func @_feedforward_kernel(%arg0: i32, %arg1: i32, %arg2: memref<1x4x16x4xf32, #tpu.memory_space<vmem>>, %arg3: memref<1x1x2x16x4xf32, #tpu.memory_space<vmem>>, %arg4: memref<4x128xf32, #tpu.memory_space<vmem>>, %arg5: memref<3x3x128xf32, #tpu.memory_space<vmem>>, %arg6: memref<128x4xf32, #tpu.memory_space<vmem>>, %arg7: memref<1x4x16x4xf32, #tpu.memory_space<vmem>>, %arg8: memref<6x16x128xf32, #tpu.memory_space<vmem>>) attributes {dimension_semantics = [#tpu.dimension_semantics<parallel>, #tpu.dimension_semantics<parallel>], iteration_bounds = array<i64: 2, 4>, scalar_prefetch = 0 : i64, scratch_operands = 1 : i64, tpu.core_type = #tpu.core_type<tc>, window_params = [{transform_indices = @transform_0, window_bounds = array<i64: 1, 4, 16, 4>}, {transform_indices = @transform_1, window_bounds = array<i64: 1, 1, 2, 16, 4>}, {pipeline_mode = #tpu.pipeline_mode<synchronous>, transform_indices = @transform_2, window_bounds = array<i64: 4, 128>}, {pipeline_mode = #tpu.pipeline_mode<synchronous>, transform_indices = @transform_3, window_bounds = array<i64: 3, 3, 128>}, {pipeline_mode = #tpu.pipeline_mode<synchronous>, transform_indices = @transform_4, window_bounds = array<i64: 128, 4>}, {transform_indices = @transform_5, window_bounds = array<i64: 1, 4, 16, 4>}]} {
    %c0 = arith.constant 0 : index
    %c0_0 = arith.constant 0 : index
    %c0_1 = arith.constant 0 : index
    %c0_2 = arith.constant 0 : index
    %0 = vector.load %arg2[%c0, %c0_0, %c0_1, %c0_2] : memref<1x4x16x4xf32, #tpu.memory_space<vmem>>, vector<1x4x16x4xf32>
    %1 = vector.shape_cast %0 : vector<1x4x16x4xf32> to vector<4x16x4xf32>
    %2 = vector.shape_cast %1 : vector<4x16x4xf32> to vector<64x4xf32>
    %c0_3 = arith.constant 0 : index
    %c0_4 = arith.constant 0 : index
    %3 = vector.load %arg4[%c0_3, %c0_4] : memref<4x128xf32, #tpu.memory_space<vmem>>, vector<4x128xf32>
    %cst = arith.constant dense<0.000000e+00> : vector<64x128xf32>
    %4 = tpu.matmul %2, %3, %cst {dimension_numbers = #tpu.dot_dimension_numbers<[1], [0], [0], [1], [0, 0, 1, 1], [], []>} : vector<64x4xf32>, vector<4x128xf32>, vector<64x128xf32> -> vector<64x128xf32>
    %cst_5 = arith.constant 5.000000e-01 : f32
    %5 = vector.broadcast %cst_5 : f32 to vector<64x128xf32>
    %6 = arith.mulf %5, %4 : vector<64x128xf32>
    %cst_6 = arith.constant 0.707106769 : f32
    %7 = vector.broadcast %cst_6 : f32 to vector<64x128xf32>
    %8 = arith.mulf %4, %7 : vector<64x128xf32>
    %9 = math.erf %8 : vector<64x128xf32>
    %cst_7 = arith.constant 1.000000e+00 : f32
    %10 = vector.broadcast %cst_7 : f32 to vector<64x128xf32>
    %11 = arith.addf %10, %9 : vector<64x128xf32>
    %12 = arith.mulf %6, %11 : vector<64x128xf32>
    %13 = vector.shape_cast %12 : vector<64x128xf32> to vector<4x16x128xf32>
    %c1 = arith.constant 1 : index
    %c0_8 = arith.constant 0 : index
    %c0_9 = arith.constant 0 : index
    %14 = vector.load %arg8[%c1, %c0_8, %c0_9] : memref<6x16x128xf32, #tpu.memory_space<vmem>>, vector<4x16x128xf32>
    tpu.vector_store %arg8[%c1, %c0_8, %c0_9], %13 {strides = array<i32>} : memref<6x16x128xf32, #tpu.memory_space<vmem>>, vector<4x16x128xf32>,
    %c0_10 = arith.constant 0 : index
    %c0_11 = arith.constant 0 : index
    %c0_12 = arith.constant 0 : index
    %c0_13 = arith.constant 0 : index
    %c0_14 = arith.constant 0 : index
    %15 = vector.load %arg3[%c0_10, %c0_11, %c0_12, %c0_13, %c0_14] : memref<1x1x2x16x4xf32, #tpu.memory_space<vmem>>, vector<1x1x2x16x4xf32>
    %16 = vector.shape_cast %15 : vector<1x1x2x16x4xf32> to vector<2x16x4xf32>
    %17 = vector.shape_cast %16 : vector<2x16x4xf32> to vector<32x4xf32>
    %c0_15 = arith.constant 0 : index
    %c0_16 = arith.constant 0 : index
    %18 = vector.load %arg4[%c0_15, %c0_16] : memref<4x128xf32, #tpu.memory_space<vmem>>, vector<4x128xf32>
    %cst_17 = arith.constant dense<0.000000e+00> : vector<32x128xf32>
    %19 = tpu.matmul %17, %18, %cst_17 {dimension_numbers = #tpu.dot_dimension_numbers<[1], [0], [0], [1], [0, 0, 1, 1], [], []>} : vector<32x4xf32>, vector<4x128xf32>, vector<32x128xf32> -> vector<32x128xf32>
    %cst_18 = arith.constant 5.000000e-01 : f32
    %20 = vector.broadcast %cst_18 : f32 to vector<32x128xf32>
    %21 = arith.mulf %20, %19 : vector<32x128xf32>
    %cst_19 = arith.constant 0.707106769 : f32
    %22 = vector.broadcast %cst_19 : f32 to vector<32x128xf32>
    %23 = arith.mulf %19, %22 : vector<32x128xf32>
    %24 = math.erf %23 : vector<32x128xf32>
    %cst_20 = arith.constant 1.000000e+00 : f32
    %25 = vector.broadcast %cst_20 : f32 to vector<32x128xf32>
    %26 = arith.addf %25, %24 : vector<32x128xf32>
    %27 = arith.mulf %21, %26 : vector<32x128xf32>
    %28 = vector.shape_cast %27 : vector<32x128xf32> to vector<2x16x128xf32>
    %29 = vector.extract_strided_slice %28 {offsets = [0, 0, 0], sizes = [1, 16, 128], strides = [1, 1, 1]} : vector<2x16x128xf32> to vector<1x16x128xf32>
    %c0_21 = arith.constant 0 : index
    %c0_22 = arith.constant 0 : index
    %c0_23 = arith.constant 0 : index
    %30 = vector.load %arg8[%c0_21, %c0_22, %c0_23] : memref<6x16x128xf32, #tpu.memory_space<vmem>>, vector<1x16x128xf32>
    tpu.vector_store %arg8[%c0_21, %c0_22, %c0_23], %29 {strides = array<i32>} : memref<6x16x128xf32, #tpu.memory_space<vmem>>, vector<1x16x128xf32>,
    %31 = vector.extract_strided_slice %28 {offsets = [1, 0, 0], sizes = [1, 16, 128], strides = [1, 1, 1]} : vector<2x16x128xf32> to vector<1x16x128xf32>
    %c5 = arith.constant 5 : index
    %c0_24 = arith.constant 0 : index
    %c0_25 = arith.constant 0 : index
    %32 = vector.load %arg8[%c5, %c0_24, %c0_25] : memref<6x16x128xf32, #tpu.memory_space<vmem>>, vector<1x16x128xf32>
    tpu.vector_store %arg8[%c5, %c0_24, %c0_25], %31 {strides = array<i32>} : memref<6x16x128xf32, #tpu.memory_space<vmem>>, vector<1x16x128xf32>,
    %c0_26 = arith.constant 0 : index
    %c0_27 = arith.constant 0 : index
    %c0_28 = arith.constant 0 : index
    %33 = vector.load %arg5[%c0_26, %c0_27, %c0_28] : memref<3x3x128xf32, #tpu.memory_space<vmem>>, vector<3x3x128xf32>
    %34 = tpu.iota {dimensions = array<i32: 1>} : vector<1x16x1xi32>
    %c0_29 = arith.constant 0 : index
    %c0_30 = arith.constant 0 : index
    %c0_31 = arith.constant 0 : index
    %35 = vector.load %arg8[%c0_29, %c0_30, %c0_31] : memref<6x16x128xf32, #tpu.memory_space<vmem>>, vector<4x16x128xf32>
    %36 = vector.extract_strided_slice %33 {offsets = [0, 1, 0], sizes = [1, 1, 128], strides = [1, 1, 1]} : vector<3x3x128xf32> to vector<1x1x128xf32>
    %37 = vector.shape_cast %36 : vector<1x1x128xf32> to vector<128xf32>
    %38 = vector.shape_cast %37 : vector<128xf32> to vector<1x1x128xf32>
    %39 = vector.broadcast %38 : vector<1x1x128xf32> to vector<4x16x128xf32>
    %40 = arith.mulf %35, %39 : vector<4x16x128xf32>
    %c1_32 = arith.constant 1 : index
    %c0_33 = arith.constant 0 : index
    %c0_34 = arith.constant 0 : index
    %41 = vector.load %arg8[%c1_32, %c0_33, %c0_34] : memref<6x16x128xf32, #tpu.memory_space<vmem>>, vector<4x16x128xf32>
    %42 = vector.extract_strided_slice %33 {offsets = [1, 1, 0], sizes = [1, 1, 128], strides = [1, 1, 1]} : vector<3x3x128xf32> to vector<1x1x128xf32>
    %43 = vector.shape_cast %42 : vector<1x1x128xf32> to vector<128xf32>
    %44 = vector.shape_cast %43 : vector<128xf32> to vector<1x1x128xf32>
    %45 = vector.broadcast %44 : vector<1x1x128xf32> to vector<4x16x128xf32>
    %46 = arith.mulf %41, %45 : vector<4x16x128xf32>
    %47 = arith.addf %40, %46 : vector<4x16x128xf32>
    %c2 = arith.constant 2 : index
    %c0_35 = arith.constant 0 : index
    %c0_36 = arith.constant 0 : index
    %48 = vector.load %arg8[%c2, %c0_35, %c0_36] : memref<6x16x128xf32, #tpu.memory_space<vmem>>, vector<4x16x128xf32>
    %49 = vector.extract_strided_slice %33 {offsets = [2, 1, 0], sizes = [1, 1, 128], strides = [1, 1, 1]} : vector<3x3x128xf32> to vector<1x1x128xf32>
    %50 = vector.shape_cast %49 : vector<1x1x128xf32> to vector<128xf32>
    %51 = vector.shape_cast %50 : vector<128xf32> to vector<1x1x128xf32>
    %52 = vector.broadcast %51 : vector<1x1x128xf32> to vector<4x16x128xf32>
    %53 = arith.mulf %48, %52 : vector<4x16x128xf32>
    %54 = arith.addf %47, %53 : vector<4x16x128xf32>
    %c0_i32 = arith.constant 0 : i32
    %55 = vector.broadcast %c0_i32 : i32 to vector<1x16x1xi32>
    %56 = arith.cmpi eq, %34, %55 : vector<1x16x1xi32>
    %c0_37 = arith.constant 0 : index
    %c0_38 = arith.constant 0 : index
    %c0_39 = arith.constant 0 : index
    %57 = vector.load %arg8[%c0_37, %c0_38, %c0_39] : memref<6x16x128xf32, #tpu.memory_space<vmem>>, vector<4x16x128xf32>
    %58 = vector.extract_strided_slice %33 {offsets = [0, 0, 0], sizes = [1, 1, 128], strides = [1, 1, 1]} : vector<3x3x128xf32> to vector<1x1x128xf32>
    %59 = vector.shape_cast %58 : vector<1x1x128xf32> to vector<128xf32>
    %60 = vector.shape_cast %59 : vector<128xf32> to vector<1x1x128xf32>
    %61 = vector.broadcast %60 : vector<1x1x128xf32> to vector<4x16x128xf32>
    %62 = arith.mulf %57, %61 : vector<4x16x128xf32>
    %c1_40 = arith.constant 1 : index
    %c0_41 = arith.constant 0 : index
    %c0_42 = arith.constant 0 : index
    %63 = vector.load %arg8[%c1_40, %c0_41, %c0_42] : memref<6x16x128xf32, #tpu.memory_space<vmem>>, vector<4x16x128xf32>
    %64 = vector.extract_strided_slice %33 {offsets = [1, 0, 0], sizes = [1, 1, 128], strides = [1, 1, 1]} : vector<3x3x128xf32> to vector<1x1x128xf32>
    %65 = vector.shape_cast %64 : vector<1x1x128xf32> to vector<128xf32>
    %66 = vector.shape_cast %65 : vector<128xf32> to vector<1x1x128xf32>
    %67 = vector.broadcast %66 : vector<1x1x128xf32> to vector<4x16x128xf32>
    %68 = arith.mulf %63, %67 : vector<4x16x128xf32>
    %69 = arith.addf %62, %68 : vector<4x16x128xf32>
    %c2_43 = arith.constant 2 : index
    %c0_44 = arith.constant 0 : index
    %c0_45 = arith.constant 0 : index
    %70 = vector.load %arg8[%c2_43, %c0_44, %c0_45] : memref<6x16x128xf32, #tpu.memory_space<vmem>>, vector<4x16x128xf32>
    %71 = vector.extract_strided_slice %33 {offsets = [2, 0, 0], sizes = [1, 1, 128], strides = [1, 1, 1]} : vector<3x3x128xf32> to vector<1x1x128xf32>
    %72 = vector.shape_cast %71 : vector<1x1x128xf32> to vector<128xf32>
    %73 = vector.shape_cast %72 : vector<128xf32> to vector<1x1x128xf32>
    %74 = vector.broadcast %73 : vector<1x1x128xf32> to vector<4x16x128xf32>
    %75 = arith.mulf %70, %74 : vector<4x16x128xf32>
    %76 = arith.addf %69, %75 : vector<4x16x128xf32>
    %c1_i32 = arith.constant 1 : i32
    %77 = tpu.dynamic_rotate %76 by %c1_i32 dim 1 : vector<4x16x128xf32>, i32 -> vector<4x16x128xf32>
    %cst_46 = arith.constant 0.000000e+00 : f32
    %78 = vector.shape_cast %56 : vector<1x16x1xi1> to vector<1x16x1xi1>
    %79 = vector.broadcast %78 : vector<1x16x1xi1> to vector<4x16x128xi1>
    %80 = vector.broadcast %cst_46 : f32 to vector<4x16x128xf32>
    %81 = arith.select %79, %80, %77 : vector<4x16x128xi1>, vector<4x16x128xf32>
    %82 = arith.addf %54, %81 : vector<4x16x128xf32>
    %c15_i32 = arith.constant 15 : i32
    %83 = vector.broadcast %c15_i32 : i32 to vector<1x16x1xi32>
    %84 = arith.cmpi eq, %34, %83 : vector<1x16x1xi32>
    %c0_47 = arith.constant 0 : index
    %c0_48 = arith.constant 0 : index
    %c0_49 = arith.constant 0 : index
    %85 = vector.load %arg8[%c0_47, %c0_48, %c0_49] : memref<6x16x128xf32, #tpu.memory_space<vmem>>, vector<4x16x128xf32>
    %86 = vector.extract_strided_slice %33 {offsets = [0, 2, 0], sizes = [1, 1, 128], strides = [1, 1, 1]} : vector<3x3x128xf32> to vector<1x1x128xf32>
    %87 = vector.shape_cast %86 : vector<1x1x128xf32> to vector<128xf32>
    %88 = vector.shape_cast %87 : vector<128xf32> to vector<1x1x128xf32>
    %89 = vector.broadcast %88 : vector<1x1x128xf32> to vector<4x16x128xf32>
    %90 = arith.mulf %85, %89 : vector<4x16x128xf32>
    %c1_50 = arith.constant 1 : index
    %c0_51 = arith.constant 0 : index
    %c0_52 = arith.constant 0 : index
    %91 = vector.load %arg8[%c1_50, %c0_51, %c0_52] : memref<6x16x128xf32, #tpu.memory_space<vmem>>, vector<4x16x128xf32>
    %92 = vector.extract_strided_slice %33 {offsets = [1, 2, 0], sizes = [1, 1, 128], strides = [1, 1, 1]} : vector<3x3x128xf32> to vector<1x1x128xf32>
    %93 = vector.shape_cast %92 : vector<1x1x128xf32> to vector<128xf32>
    %94 = vector.shape_cast %93 : vector<128xf32> to vector<1x1x128xf32>
    %95 = vector.broadcast %94 : vector<1x1x128xf32> to vector<4x16x128xf32>
    %96 = arith.mulf %91, %95 : vector<4x16x128xf32>
    %97 = arith.addf %90, %96 : vector<4x16x128xf32>
    %c2_53 = arith.constant 2 : index
    %c0_54 = arith.constant 0 : index
    %c0_55 = arith.constant 0 : index
    %98 = vector.load %arg8[%c2_53, %c0_54, %c0_55] : memref<6x16x128xf32, #tpu.memory_space<vmem>>, vector<4x16x128xf32>
    %99 = vector.extract_strided_slice %33 {offsets = [2, 2, 0], sizes = [1, 1, 128], strides = [1, 1, 1]} : vector<3x3x128xf32> to vector<1x1x128xf32>
    %100 = vector.shape_cast %99 : vector<1x1x128xf32> to vector<128xf32>
    %101 = vector.shape_cast %100 : vector<128xf32> to vector<1x1x128xf32>
    %102 = vector.broadcast %101 : vector<1x1x128xf32> to vector<4x16x128xf32>
    %103 = arith.mulf %98, %102 : vector<4x16x128xf32>
    %104 = arith.addf %97, %103 : vector<4x16x128xf32>
    %c15_i32_56 = arith.constant 15 : i32
    %105 = tpu.dynamic_rotate %104 by %c15_i32_56 dim 1 : vector<4x16x128xf32>, i32 -> vector<4x16x128xf32>
    %cst_57 = arith.constant 0.000000e+00 : f32
    %106 = vector.shape_cast %84 : vector<1x16x1xi1> to vector<1x16x1xi1>
    %107 = vector.broadcast %106 : vector<1x16x1xi1> to vector<4x16x128xi1>
    %108 = vector.broadcast %cst_57 : f32 to vector<4x16x128xf32>
    %109 = arith.select %107, %108, %105 : vector<4x16x128xi1>, vector<4x16x128xf32>
    %110 = arith.addf %82, %109 : vector<4x16x128xf32>
    %cst_58 = arith.constant 5.000000e-01 : f32
    %111 = vector.broadcast %cst_58 : f32 to vector<4x16x128xf32>
    %112 = arith.mulf %111, %110 : vector<4x16x128xf32>
    %cst_59 = arith.constant 0.707106769 : f32
    %113 = vector.broadcast %cst_59 : f32 to vector<4x16x128xf32>
    %114 = arith.mulf %110, %113 : vector<4x16x128xf32>
    %115 = math.erf %114 : vector<4x16x128xf32>
    %cst_60 = arith.constant 1.000000e+00 : f32
    %116 = vector.broadcast %cst_60 : f32 to vector<4x16x128xf32>
    %117 = arith.addf %116, %115 : vector<4x16x128xf32>
    %118 = arith.mulf %112, %117 : vector<4x16x128xf32>
    %119 = vector.shape_cast %118 : vector<4x16x128xf32> to vector<64x128xf32>
    %c0_61 = arith.constant 0 : index
    %c0_62 = arith.constant 0 : index
    %120 = vector.load %arg6[%c0_61, %c0_62] : memref<128x4xf32, #tpu.memory_space<vmem>>, vector<128x4xf32>
    %cst_63 = arith.constant dense<0.000000e+00> : vector<64x4xf32>
    %121 = tpu.matmul %119, %120, %cst_63 {dimension_numbers = #tpu.dot_dimension_numbers<[1], [0], [0], [1], [0, 0, 1, 1], [], []>} : vector<64x128xf32>, vector<128x4xf32>, vector<64x4xf32> -> vector<64x4xf32>
    %122 = vector.shape_cast %121 : vector<64x4xf32> to vector<4x16x4xf32>
    %c0_64 = arith.constant 0 : index
    %c0_65 = arith.constant 0 : index
    %c0_66 = arith.constant 0 : index
    %c0_67 = arith.constant 0 : index
    %123 = vector.load %arg7[%c0_64, %c0_65, %c0_66, %c0_67] : memref<1x4x16x4xf32, #tpu.memory_space<vmem>>, vector<1x4x16x4xf32>
    %124 = vector.shape_cast %123 : vector<1x4x16x4xf32> to vector<4x16x4xf32>
    %125 = vector.shape_cast %122 : vector<4x16x4xf32> to vector<1x4x16x4xf32>
    tpu.vector_store %arg7[%c0_64, %c0_65, %c0_66, %c0_67], %125 {strides = array<i32>} : memref<1x4x16x4xf32, #tpu.memory_space<vmem>>, vector<1x4x16x4xf32>,
    return
  }
  func.func @transform_0(%arg0: i32, %arg1: i32) -> (i32, i32, i32, i32) {
    %c0_i32 = arith.constant 0 : i32
    %c0_i32_0 = arith.constant 0 : i32
    %c0_i32_1 = arith.constant 0 : i32
    return %arg0, %arg1, %c0_i32, %c0_i32_0 : i32, i32, i32, i32
  }
  func.func @transform_1(%arg0: i32, %arg1: i32) -> (i32, i32, i32, i32, i32) {
    %c0_i32 = arith.constant 0 : i32
    %c0_i32_0 = arith.constant 0 : i32
    %c0_i32_1 = arith.constant 0 : i32
    %c0_i32_2 = arith.constant 0 : i32
    return %arg0, %arg1, %c0_i32, %c0_i32_0, %c0_i32_1 : i32, i32, i32, i32, i32
  }
  func.func @transform_2(%arg0: i32, %arg1: i32) -> (i32, i32) {
    %c0_i32 = arith.constant 0 : i32
    %c0_i32_0 = arith.constant 0 : i32
    %c0_i32_1 = arith.constant 0 : i32
    return %c0_i32, %c0_i32_0 : i32, i32
  }
  func.func @transform_3(%arg0: i32, %arg1: i32) -> (i32, i32, i32) {
    %c0_i32 = arith.constant 0 : i32
    %c0_i32_0 = arith.constant 0 : i32
    %c0_i32_1 = arith.constant 0 : i32
    %c0_i32_2 = arith.constant 0 : i32
    return %c0_i32, %c0_i32_0, %c0_i32_1 : i32, i32, i32
  }
  func.func @transform_4(%arg0: i32, %arg1: i32) -> (i32, i32) {
    %c0_i32 = arith.constant 0 : i32
    %c0_i32_0 = arith.constant 0 : i32
    %c0_i32_1 = arith.constant 0 : i32
    return %c0_i32, %c0_i32_0 : i32, i32
  }
  func.func @transform_5(%arg0: i32, %arg1: i32) -> (i32, i32, i32, i32) {
    %c0_i32 = arith.constant 0 : i32
    %c0_i32_0 = arith.constant 0 : i32
    %c0_i32_1 = arith.constant 0 : i32
    return %arg0, %arg1, %c0_i32, %c0_i32_0 : i32, i32, i32, i32
  }
}

</mosaic_0001>

<bundles_post_ra>
// kernel: tpu_custom_call.1
= control target key start
LH: loop header
LB: loop body
LE: loop exit
PB: predicated region body
PF: predicated region fallthrough
CT: control target
= control target key end

     0   :  { %s1497_s18 = smov 0   ;;  %s1499_s19 = smov 0   ;;  %s1902_s0 = inlined_call_operand.vmem [shape: f32[2,16,16,4], index: 0, kind: input, shape index: {}]   ;;  %s1903_s1 = inlined_call_operand.vmem [shape: f32[2,4,2,16,4], index: 1, kind: input, shape index: {}]   ;;  %s1904_s2 = inlined_call_operand.vmem [shape: f32[4,128], index: 2, kind: input, shape index: {}]   ;;  %s1905_s3 = inlined_call_operand.vmem [shape: f32[3,3,128], index: 3, kind: input, shape index: {}]   ;;  %s1906_s4 = inlined_call_operand.vmem [shape: f32[128,4], index: 4, kind: input, shape index: {}]   ;;  %s1907_s5 = inlined_call_operand.vmem [shape: f32[2,16,16,4], index: 5, kind: output, shape index: {}]  }
   0x1   :  { %s1501_s20 = smov 0   ;;  %s1503_s21 = smov 0  }
   0x2   :  { %s1505_s22 = smov 0  }
   0x3 LB: > { %s24_s23 = sadd.s32 1, %s1457_s20  ;;  %s27_s24 = sadd.s32 1, %s1461_s21  ;;  %s1465_s22 = sphi %s1505_s22, %s15_s22   ;;  %s1461_s21 = sphi %s1503_s21, %s1911_s21   ;;  %s1457_s20 = sphi %s1501_s20, %s1910_s20   ;;  %s1453_s19 = sphi %s1499_s19, %s1909_s19   ;;  %s1449_s18 = sphi %s1497_s18, %s1908_s18  }
   0x4   : > { %p25_p0 = scmp.ge.s32.totalorder %s24_s23, 4  ;;  %p1183_p1 = scmp.ge.s32.totalorder %s1465_s22, 1 }
   0x5   : > { %p225_p2 = scmp.lt.s32.totalorder %s1465_s22, 9 }
   0x6   : > { %s1913_s23 = smov (%p25_p0, %s24_s23), 0  ;;  %s1915_s24 = smov (!%p25_p0, %s27_s24), %s1461_s21 }
   0x7   : > { %p226_p3 = pnand %p1183_p1, %p225_p2  ;;  %p29_p4 = scmp.ge.s32.totalorder %s1915_s24, 2 }
   0x8   : > { %s1184_s29 = sshll.u32 (!%p226_p3), %s1449_s18, 2  ;;  %p273_p5 = scmp.lt.s32.totalorder (!%p226_p3), %s1453_s19, 1 }
   0x9   : > { %s1917_s24 = smov (%p29_p4, %s1915_s24), 0  ;;  %229 = sbr.rel (%p226_p3) target bundleno = 510 (0x1fe), region = 40 }
   0xa   : > { %p275_p6 = scmp.lt.s32.totalorder (!%p226_p3), %s1184_s29, 15  ;;  %p285_p7 = scmp.lt.s32.totalorder (!%p226_p3), %s1449_s18, 3 }
   0xe   : > { %vm337_vm0 = vcmask 1043456   ;;  %v499_v0 = vld [vmem:[%s1904_s2] sm:$0xf]  ;;  %s1919_s19 = smov (!%p273_p5, %s1453_s19), 1  ;;  %s1921_s29 = smov (!%p275_p6, %s1184_s29), 15  ;;  %vm312_vm1 = vcmask 31744   ;;  %v628_v32 = vlaneseq }
   0xf   : > { %v311_v1 = vld [vmem:[%s1904_s2] sm:$0xf]  ;;  %1263 = vmatprep.subr.msk.mxu1 %vm337_vm0, %v499_v0  ;;  %s1186_s30 = sshll.u32 %s1919_s19, 5  ;;  %s1185_s6 = sshll.u32 %s1921_s29, 1  ;;  %v945_v14 = vld [vmem:[%s1906_s4 + $0x78] sm:$0xff]  ;;  %v944_v15 = vld [vmem:[%s1906_s4 + $0x70] sm:$0xff] }
  0x10   : > { %1249 = vmatprep.subr.msk.mxu0 %vm337_vm0, %v311_v1  ;;  %1264 = vmatpush3.msk.msra.mxu1 %vm337_vm0, %v499_v0  ;;  %s1537_s7 = sadd.s32 %s1186_s30, %s1185_s6  ;;  %s1189_s12 = sshll.u32 %s1919_s19, 4  ;;  %v943_v16 = vld [vmem:[%s1906_s4 + $0x68] sm:$0xff]  ;;  %v942_v17 = vld [vmem:[%s1906_s4 + $0x60] sm:$0xff]  ;;  %v941_v18 = vld [vmem:[%s1906_s4 + $0x58] sm:$0xff]  ;;  %v1609_v38 = vshrl.u32 %v628_v32, 7 }
  0x11   : > { %1250 = vmatpush3.msk.msra.mxu0 %vm337_vm0, %v311_v1  ;;  %s1187_s8 = sshll.u32 %s1537_s7, 3  ;;  %s1923_s18 = smov (!%p285_p7, %s1449_s18), 3  ;;  %1315 = vmatprep.subr.mxu1 %v945_v14  ;;  %v940_v19 = vld [vmem:[%s1906_s4 + $0x50] sm:$0xff]  ;;  %v939_v20 = vld [vmem:[%s1906_s4 + $0x48] sm:$0xff]  ;;  %v938_v21 = vld [vmem:[%s1906_s4 + $0x40] sm:$0xff] }
  0x12   : > { %s281_s11 = scalar_lea.vmem %s1902_s0, %s1187_s8  ;;  %s1188_s13 = sshll.u32 %s1923_s18, 2  ;;  %1271 = vmatprep.subr.mxu0 %v945_v14  ;;  %v937_v22 = vld [vmem:[%s1906_s4 + $0x38] sm:$0xff]  ;;  %v936_v23 = vld [vmem:[%s1906_s4 + $0x30] sm:$0xff]  ;;  %v935_v24 = vld [vmem:[%s1906_s4 + $0x28] sm:$0xff]  ;;  %v641_v45 = vsub.s32 1, %v1609_v38  ;;  %v712_v50 = vsub.s32 0, %v1609_v38 }
  0x13   : > { %v303_v2 = vld [vmem:[%s281_s11] sm:$0xff]  ;;  %v304_v3 = vld [vmem:[%s281_s11 + $0x8] sm:$0xff]  ;;  %v305_v4 = vld [vmem:[%s281_s11 + $0x10] sm:$0xff]  ;;  %s289_s14 = sadd.s32 %s1189_s12, %s1188_s13  ;;  %v803_v51 = vsub.s32 2, %v1609_v38  ;;  %vm770_vm2 = vcmp.lt.s32.totalorder %v1609_v38, 1  ;;  %vm708_vm3 = vcmp.eq.s32.totalorder %v1609_v38, 0  ;;  %s301_s28 = scalar_lea.vmem %s1907_s5, %s1187_s8 }
  0x14   : > { %1251 = vmatprep.mubr.msk.f32.mxu0 %vm312_vm1, %v303_v2  ;;  %v306_v5 = vld [vmem:[%s281_s11 + $0x18] sm:$0xff]  ;;  %s1190_s15 = sshll.u32 %s289_s14, 3  ;;  %v307_v6 = vld [vmem:[%s281_s11 + $0x20] sm:$0xff]  ;;  %v308_v10 = vld [vmem:[%s281_s11 + $0x28] sm:$0xff]  ;;  %vm861_vm4 = vcmp.lt.s32.totalorder %v1609_v38, 7 }
  0x15   : > { %1252 = vmatmul.mubr.msk.f32.vlgmr.msra.gmra.mxu0 %vm312_vm1, %v304_v3  ;;  %s291_s25 = scalar_lea.vmem %s1903_s1, %s1190_s15  ;;  %v309_v11 = vld [vmem:[%s281_s11 + $0x30] sm:$0xff]  ;;  %v310_v13 = vld [vmem:[%s281_s11 + $0x38] sm:$0xff]  ;;  %v934_v25 = vld [vmem:[%s1906_s4 + $0x20] sm:$0xff] }
  0x16   : > { %1254 = vmatprep.mubr.msk.f32.mxu0 %vm312_vm1, %v305_v4  ;;  %v495_v7 = vld [vmem:[%s291_s25] sm:$0xff]  ;;  %v496_v8 = vld [vmem:[%s291_s25 + $0x8] sm:$0xff]  ;;  %v497_v9 = vld [vmem:[%s291_s25 + $0x10] sm:$0xff]  ;;  %1272 = vmatpush3.msra.mxu0 %v945_v14 }
  0x17   : > { %1265 = vmatprep.mubr.msk.f32.mxu1 %vm312_vm1, %v495_v7  ;;  %v498_v12 = vld [vmem:[%s291_s25 + $0x18] sm:$0xff]  ;;  %1273 = vmatprep.subr.mxu0 %v944_v15  ;;  %v932_v27 = vld [vmem:[%s1906_s4 + $0x10] sm:$0xff]  ;;  %v931_v28 = vld [vmem:[%s1906_s4 + $0x8] sm:$0xff] }
  0x18   : > { %1266 = vmatmul.mubr.msk.f32.vlgmr.msra.gmra.mxu1 %vm312_vm1, %v496_v8  ;;  %1274 = vmatpush3.msra.mxu0 %v944_v15  ;;  %v933_v26 = vld [vmem:[%s1906_s4 + $0x18] sm:$0xff]  ;;  %v930_v29 = vld [vmem:[%s1906_s4] sm:$0xff]  ;;  %v627_v59 = vld [vmem:[%s1905_s3 + $0x8] sm:$0x7] }
  0x19   : > { %1255 = vmatmul.mubr.msk.f32.gmra.mxu0 %vm312_vm1, %v306_v5  ;;  %1268 = vmatprep.mubr.msk.f32.mxu1 %vm312_vm1, %v497_v9  ;;  %v625_v49 = vld [vmem:[%s1905_s3] sm:$0x7]  ;;  %v626_v56 = vld [vmem:[%s1905_s3 + $0x4] sm:$0x7]  ;;  %v1635_v7 = vrot.slane %v627_v59, %v641_v45 }
  0x1a   : > { %1257 = vmatprep.mubr.msk.f32.mxu0 %vm312_vm1, %v307_v6  ;;  %1331 = vmatpush3.msra.mxu1 %v945_v14  ;;  %v1620_v58 = vrot.slane %v625_v49, %v641_v45  ;;  %v1625_v62 = vrot.slane %v625_v49, %v712_v50  ;;  %v1627_v63 = vrot.slane %v625_v49, %v803_v51 }
  0x1b   : > { %1316 = vmatprep.subr.mxu1 %v944_v15  ;;  %1275 = vmatprep.subr.mxu0 %v943_v16  ;;  %v1629_v2 = vrot.slane %v626_v56, %v641_v45  ;;  %v1631_v3 = vrot.slane %v626_v56, %v712_v50  ;;  %v1633_v4 = vrot.slane %v626_v56, %v803_v51 }
  0x1c   : > { %1269 = vmatmul.mubr.msk.f32.gmra.mxu1 %vm312_vm1, %v498_v12  ;;  %1276 = vmatpush3.msra.mxu0 %v943_v16  ;;  %v1642_v12 = vadd.s32 8, %v1609_v38 }
  0x1d   : > { %1258 = vmatmul.mubr.msk.f32.gmra.mxu0 %vm312_vm1, %v308_v10  ;;  %1332 = vmatpush3.msra.mxu1 %v944_v15  ;;  %v1637_v10 = vrot.slane %v627_v59, %v712_v50 }
  0x1e   : > { %1260 = vmatprep.mubr.msk.f32.mxu0 %vm312_vm1, %v309_v11  ;;  %1317 = vmatprep.subr.mxu1 %v943_v16  ;;  %v1639_v11 = vrot.slane %v627_v59, %v803_v51  ;;  %vm800_vm5 = vcmp.eq.s32.totalorder %v1642_v12, 15 }
  0x1f   : > { %1333 = vmatpush3.msra.mxu1 %v943_v16  ;;  %1277 = vmatprep.subr.mxu0 %v942_v17 }
  0x20   : > { %1318 = vmatprep.subr.mxu1 %v942_v17  ;;  %1278 = vmatpush3.msra.mxu0 %v942_v17 }
  0x21   : > { %1261 = vmatmul.mubr.msk.f32.gmra.mxu0 %vm312_vm1, %v310_v13  ;;  %1334 = vmatpush3.msra.mxu1 %v942_v17 }
  0x22   : > { %1279 = vmatprep.subr.mxu0 %v941_v18  ;;  %1319 = vmatprep.subr.mxu1 %v941_v18 }
  0x23   : > { %1280 = vmatpush3.msra.mxu0 %v941_v18  ;;  %1335 = vmatpush3.msra.mxu1 %v941_v18 }
  0x24   : > { %1281 = vmatprep.subr.mxu0 %v940_v19  ;;  %1320 = vmatprep.subr.mxu1 %v940_v19 }
  0x25   : > { %1282 = vmatpush3.msra.mxu0 %v940_v19  ;;  %1336 = vmatpush3.msra.mxu1 %v940_v19 }
  0x26   : > { %1283 = vmatprep.subr.mxu0 %v939_v20  ;;  %1321 = vmatprep.subr.mxu1 %v939_v20 }
  0x27   : > { %1284 = vmatpush3.msra.mxu0 %v939_v20  ;;  %1337 = vmatpush3.msra.mxu1 %v939_v20 }
  0x28   : > { %1285 = vmatprep.subr.mxu0 %v938_v21  ;;  %1322 = vmatprep.subr.mxu1 %v938_v21 }
  0x29   : > { %1286 = vmatpush3.msra.mxu0 %v938_v21  ;;  %1338 = vmatpush3.msra.mxu1 %v938_v21 }
  0x2a   : > { %1287 = vmatprep.subr.mxu0 %v937_v22  ;;  %1323 = vmatprep.subr.mxu1 %v937_v22 }
  0x2b   : > { %1288 = vmatpush3.msra.mxu0 %v937_v22  ;;  %1339 = vmatpush3.msra.mxu1 %v937_v22 }
  0x2c   : > { %1289 = vmatprep.subr.mxu0 %v936_v23  ;;  %1324 = vmatprep.subr.mxu1 %v936_v23 }
  0x2d   : > { %1290 = vmatpush3.msra.mxu0 %v936_v23  ;;  %1340 = vmatpush3.msra.mxu1 %v936_v23 }
  0x2e   : > { %1291 = vmatprep.subr.mxu0 %v935_v24  ;;  %1325 = vmatprep.subr.mxu1 %v935_v24 }
  0x2f   : > { %1292 = vmatpush3.msra.mxu0 %v935_v24  ;;  %1341 = vmatpush3.msra.mxu1 %v935_v24 }
  0x30   : > { %1293 = vmatprep.subr.mxu0 %v934_v25  ;;  %1326 = vmatprep.subr.mxu1 %v934_v25 }
  0x31   : > { %1294 = vmatpush3.msra.mxu0 %v934_v25  ;;  %1342 = vmatpush3.msra.mxu1 %v934_v25 }
  0x32   : > { %1295 = vmatprep.subr.mxu0 %v933_v26  ;;  %1327 = vmatprep.subr.mxu1 %v933_v26 }
  0x33   : > { %1296 = vmatpush3.msra.mxu0 %v933_v26  ;;  %1343 = vmatpush3.msra.mxu1 %v933_v26 }
  0x34   : > { %1297 = vmatprep.subr.mxu0 %v932_v27  ;;  %1328 = vmatprep.subr.mxu1 %v932_v27 }
  0x35   : > { %1298 = vmatpush3.msra.mxu0 %v932_v27  ;;  %1344 = vmatpush3.msra.mxu1 %v932_v27 }
  0x36   : > { %1299 = vmatprep.subr.mxu0 %v931_v28  ;;  %1329 = vmatprep.subr.mxu1 %v931_v28 }
  0x37   : > { %1300 = vmatpush3.msra.mxu0 %v931_v28  ;;  %1345 = vmatpush3.msra.mxu1 %v931_v28 }
  0x38   : > { %1301 = vmatprep.subr.mxu0 %v930_v29  ;;  %1330 = vmatprep.subr.mxu1 %v930_v29 }
  0x39   : > { %1302 = vmatpush3.msra.mxu0 %v930_v29  ;;  %1346 = vmatpush3.msra.mxu1 %v930_v29 }
  0xd5   : > { %v1253_v30 = vpop.f32.mrf.mxu0 }
  0xd6   : > { %v455_v31 = vmul.f32 0.70710677, %v1253_v30  ;;  %v447_v5 = vmul.f32 0.5, %v1253_v30 }
  0xd7   : > { %v407_v33 = vpop.f32.mrf.mxu0 }
  0xd8   : > { %1387 = verf.f32 %v455_v31  ;;  %v454_v34 = vmul.f32 0.70710677, %v407_v33  ;;  %v1267_v37 = vpop.f32.mrf.mxu1  ;;  %v446_v9 = vmul.f32 0.5, %v407_v33 }
  0xd9   : > { %v1256_v35 = vpop.f32.mrf.mxu0  ;;  %v605_v40 = vmul.f32 0.70710677, %v1267_v37  ;;  %v601_v13 = vmul.f32 0.5, %v1267_v37 }
  0xda   : > { %1389 = verf.f32 %v454_v34  ;;  %v457_v36 = vmul.f32 0.70710677, %v1256_v35  ;;  %v581_v41 = vpop.f32.mrf.mxu1  ;;  %v449_v16 = vmul.f32 0.5, %v1256_v35 }
  0xdb   : > { %v417_v39 = vpop.f32.mrf.mxu0  ;;  %v604_v44 = vmul.f32 0.70710677, %v581_v41  ;;  %v600_v18 = vmul.f32 0.5, %v581_v41 }
  0xdc   : > { %1391 = verf.f32 %v457_v36  ;;  %v456_v42 = vmul.f32 0.70710677, %v417_v39  ;;  %v1270_v46 = vpop.f32.mrf.mxu1  ;;  %v448_v20 = vmul.f32 0.5, %v417_v39 }
  0xdd   : > { %v1259_v43 = vpop.f32.mrf.mxu0  ;;  %1393 = verf.f32 %v605_v40  ;;  %v607_v52 = vmul.f32 0.70710677, %v1270_v46  ;;  %v603_v19 = vmul.f32 0.5, %v1270_v46 }
  0xde   : > { %1395 = verf.f32 %v456_v42  ;;  %v459_v47 = vmul.f32 0.70710677, %v1259_v43  ;;  %v591_v53 = vpop.f32.mrf.mxu1  ;;  %v451_v21 = vmul.f32 0.5, %v1259_v43 }
  0xdf   : > { %v427_v48 = vpop.f32.mrf.mxu0  ;;  %1397 = verf.f32 %v604_v44  ;;  %v606_v57 = vmul.f32 0.70710677, %v591_v53  ;;  %v602_v24 = vmul.f32 0.5, %v591_v53 }
  0xe0   : > { %1399 = verf.f32 %v459_v47  ;;  %v458_v54 = vmul.f32 0.70710677, %v427_v48  ;;  %v450_v25 = vmul.f32 0.5, %v427_v48 }
  0xe1   : > { %v1262_v55 = vpop.f32.mrf.mxu0  ;;  %1401 = verf.f32 %v607_v52 }
  0xe2   : > { %1403 = verf.f32 %v458_v54  ;;  %v461_v60 = vmul.f32 0.70710677, %v1262_v55  ;;  %v453_v28 = vmul.f32 0.5, %v1262_v55 }
  0xe3   : > { %v437_v61 = vpop.f32.mrf.mxu0  ;;  %1405 = verf.f32 %v606_v57 }
  0xe4   : > { %v460_v0 = vmul.f32 0.70710677, %v437_v61  ;;  %1407 = verf.f32 %v461_v60  ;;  %v1649_v29 = vmul.f32 0.5, %v437_v61 }
  0xe5   : > { %v1388_v1 = vpop.eup %1387 }
  0xe6   : > { %v471_v6 = vadd.f32 1.0, %v1388_v1  ;;  %1409 = verf.f32 %v460_v0 }
  0xe7   : > { %v1390_v8 = vpop.eup %1389 }
  0xe8   : > { %v479_v14 = vmul.f32 %v471_v6, %v447_v5  ;;  %v470_v15 = vadd.f32 1.0, %v1390_v8 }
  0xe9   : > { %v1392_v17 = vpop.eup %1391 }
  0xea   : > { %v1644_v22 = vmul.f32 %v470_v15, %v446_v9  ;;  %v473_v23 = vadd.f32 1.0, %v1392_v17  ;;  %v1394_v26 = vpop.eup %1393  ;;  %v1647_v27 = vmul.f32 %v1629_v2, %v479_v14  ;;  %v727_v30 = vmul.f32 %v1631_v3, %v479_v14 }
  0xeb   : > { %v1396_v31 = vpop.eup %1395  ;;  %v613_v32 = vadd.f32 1.0, %v1394_v26  ;;  %v818_v34 = vmul.f32 %v1633_v4, %v479_v14  ;;  %v1656_v35 = vmul.f32 %v1625_v62, %v479_v14  ;;  %v1661_v40 = vmul.f32 %v1627_v63, %v479_v14 }
  0xec   : > { %v1652_v33 = vmul.f32 %v473_v23, %v449_v16  ;;  %v1398_v36 = vpop.eup %1397  ;;  %v472_v37 = vadd.f32 1.0, %v1396_v31  ;;  %v663_v39 = vmul.f32 %v1629_v2, %v1644_v22  ;;  %v1664_v41 = vmul.f32 %v1620_v58, %v479_v14 }
  0xed   : > { %v1400_v42 = vpop.eup %1399  ;;  %v617_v43 = vmul.f32 %v613_v32, %v601_v13  ;;  %v612_v44 = vadd.f32 1.0, %v1398_v36  ;;  %v726_v45 = vmul.f32 %v1631_v3, %v1644_v22  ;;  %v817_v46 = vmul.f32 %v1633_v4, %v1644_v22 }
  0xee   : > { %v1402_v47 = vpop.eup %1401  ;;  %v475_v48 = vadd.f32 1.0, %v1400_v42  ;;  %v747_v49 = vmul.f32 %v1637_v10, %v1652_v33  ;;  %v645_v50 = vmul.f32 %v1620_v58, %v1644_v22  ;;  %v1676_v51 = vmul.f32 %v1625_v62, %v1644_v22 }
  0xef   : > { %v1404_v52 = vpop.eup %1403  ;;  %v616_v53 = vmul.f32 %v612_v44, %v600_v18  ;;  %v1678_v54 = vmul.f32 %v472_v37, %v448_v20  ;;  %v838_v55 = vmul.f32 %v1639_v11, %v1652_v33  ;;  %v693_v56 = vmul.f32 %v1635_v7, %v1652_v33 }
  0xf0   : > { %v1406_v57 = vpop.eup %1405  ;;  %v715_v59 = vmul.f32 %v1625_v62, %v617_v43  ;;  %v615_v60 = vadd.f32 1.0, %v1402_v47  ;;  %v474_v61 = vadd.f32 1.0, %v1404_v52  ;;  %v729_v0 = vmul.f32 %v1631_v3, %v1652_v33 }
  0xf1   : > { %v1408_v1 = vpop.eup %1407  ;;  %v644_v5 = vmul.f32 %v1620_v58, %v617_v43  ;;  %v643_v6 = vmul.f32 %v1620_v58, %v616_v53  ;;  %v714_v8 = vmul.f32 %v1625_v62, %v616_v53  ;;  %v614_v9 = vadd.f32 1.0, %v1406_v57 }
  0xf2   : > { %v806_v14 = vmul.f32 %v1627_v63, %v617_v43  ;;  %v1692_v15 = vmul.f32 %v615_v60, %v603_v19  ;;  %v1694_v16 = vmul.f32 %v475_v48, %v451_v21  ;;  %v477_v17 = vadd.f32 1.0, %v1408_v1 }
  0xf3   : > { %v1410_v13 = vpop.eup %1409  ;;  %v805_v18 = vmul.f32 %v1627_v63, %v616_v53  ;;  %v618_v20 = vmul.f32 %v614_v9, %v602_v24  ;;  %v1699_v23 = vmul.f32 %v474_v61, %v450_v25  ;;  %v692_v26 = vmul.f32 %v1635_v7, %v1678_v54 }
  0xf4   : > { %v476_v31 = vadd.f32 1.0, %v1410_v13  ;;  %v671_v19 = vadd.f32 %v663_v39, %v643_v6  ;;  %v734_v32 = vadd.f32 %v726_v45, %v714_v8  ;;  %v735_v21 = vadd.f32 %v727_v30, %v715_v59 }
  0xf5   : > { %v1706_v36 = vmul.f32 %v1637_v10, %v1692_v15  ;;  %v1710_v37 = vmul.f32 %v1639_v11, %v1692_v15  ;;  %v1713_v24 = vmul.f32 %v1635_v7, %v618_v20  ;;  %v1715_v25 = vmul.f32 %v477_v17, %v453_v28 }
  0xf6   : > { %v1718_v42 = vmul.f32 %v1637_v10, %v618_v20  ;;  %v1721_v39 = vmul.f32 %v1639_v11, %v618_v20  ;;  %v746_v30 = vmul.f32 %v1637_v10, %v1678_v54  ;;  %v755_v43 = vadd.f32 %v747_v49, %v735_v21 }
  0xf7   : > { %v700_v44 = vadd.f32 %v692_v26, %v671_v19  ;;  %v825_v45 = vadd.f32 %v817_v46, %v805_v18  ;;  %v826_v47 = vadd.f32 %v818_v34, %v806_v14  ;;  %v837_v48 = vmul.f32 %v1639_v11, %v1678_v54 }
  0xf8   : > { %v754_v52 = vadd.f32 %v746_v30, %v734_v32  ;;  %v766_v53 = vrot.slane %v755_v43, 7  ;;  %v672_v28 = vadd.f32 %v1647_v27, %v644_v5  ;;  %v665_v57 = vmul.f32 %v1629_v2, %v1678_v54 }
  0xf9   : > { %v845_v59 = vadd.f32 %v837_v48, %v825_v45  ;;  %v846_v60 = vadd.f32 %v838_v55, %v826_v47  ;;  %v694_v61 = vmul.f32 %v1635_v7, %v1699_v23  ;;  %v728_v49 = vmul.f32 %v1631_v3, %v1678_v54 }
  0xfa   : > { %v762_v46 = vrot.slane %v754_v52, 7  ;;  %v701_v34 = vadd.f32 %v693_v56, %v672_v28  ;;  %v673_v1 = vadd.f32 %v665_v57, %v645_v50  ;;  %v748_v6 = vmul.f32 %v1637_v10, %v1699_v23 }
  0xfb   : > { %v853_v8 = vrot.slane %v845_v59, 1  ;;  %v857_v9 = vrot.slane %v846_v60, 1  ;;  %v737_v27 = vadd.f32 %v729_v0, %v1656_v35  ;;  %v749_v5 = vmul.f32 %v1637_v10, %v1694_v16 }
  0xfc   : > { %v775_v55 = vsel %vm770_vm2, %v766_v53, %v762_v46  ;;  %v771_v13 = vsel %vm770_vm2, %v762_v46, %v766_v53  ;;  %v736_v14 = vadd.f32 %v728_v49, %v1676_v51  ;;  %v807_v50 = vmul.f32 %v1627_v63, %v1644_v22 }
  0xfd   : > { %v783_v56 = vsel %vm708_vm3, 0.0, %v775_v55  ;;  %v862_v35 = vsel %vm861_vm4, %v853_v8, %v857_v9  ;;  %v792_v0 = vadd.f32 %v771_v13, %v701_v34  ;;  %v866_v17 = vsel %vm861_vm4, %v857_v9, %v853_v8 }
  0xfe   : > { %v791_v18 = vadd.f32 %v783_v56, %v700_v44  ;;  %v875_v20 = vsel %vm800_vm5, 0.0, %v866_v17  ;;  %v756_v26 = vadd.f32 %v748_v6, %v736_v14  ;;  %v757_v19 = vadd.f32 %v749_v5, %v737_v27 }
  0xff   : > { %v883_v51 = vadd.f32 %v875_v20, %v792_v0  ;;  %v819_v22 = vmul.f32 %v1633_v4, %v1678_v54  ;;  %v820_v32 = vmul.f32 %v1633_v4, %v1652_v33  ;;  %v839_v21 = vmul.f32 %v1639_v11, %v1699_v23 }
 0x100   : > { %v882_v30 = vadd.f32 %v862_v35, %v791_v18  ;;  %v763_v43 = vrot.slane %v756_v26, 7  ;;  %v767_v45 = vrot.slane %v757_v19, 7  ;;  %v840_v44 = vmul.f32 %v1639_v11, %v1694_v16 }
 0x101   : > { %v1763_v47 = vmul.f32 %v476_v31, %v1649_v29  ;;  %v899_v48 = vmul.f32 0.70710677, %v883_v51  ;;  %v827_v52 = vadd.f32 %v819_v22, %v807_v50  ;;  %v828_v53 = vadd.f32 %v820_v32, %v1661_v40 }
 0x102   : > { %v898_v28 = vmul.f32 0.70710677, %v882_v30  ;;  %v702_v57 = vadd.f32 %v694_v61, %v673_v1  ;;  %v776_v59 = vsel %vm770_vm2, %v767_v45, %v763_v43  ;;  %v666_v60 = vmul.f32 %v1629_v2, %v1652_v33 }
 0x103   : > { %1411 = verf.f32 %v899_v48  ;;  %v785_v49 = vsel %vm708_vm3, 0.0, %v776_v59  ;;  %v847_v46 = vadd.f32 %v839_v21, %v827_v52  ;;  %v848_v34 = vadd.f32 %v840_v44, %v828_v53 }
 0x104   : > { %1413 = verf.f32 %v898_v28  ;;  %v793_v29 = vadd.f32 %v785_v49, %v702_v57  ;;  %v674_v31 = vadd.f32 %v666_v60, %v1664_v41  ;;  %v695_v40 = vmul.f32 %v1635_v7, %v1694_v16 }
 0x105   : > { %v697_v61 = vmul.f32 %v1635_v7, %v1715_v25  ;;  %v854_v1 = vrot.slane %v847_v46, 1  ;;  %v858_v6 = vrot.slane %v848_v34, 1  ;;  %v772_v8 = vsel %vm770_vm2, %v763_v43, %v767_v45 }
 0x106   : > { %v891_v9 = vmul.f32 0.5, %v883_v51  ;;  %v703_v27 = vadd.f32 %v695_v40, %v674_v31  ;;  %v647_v5 = vmul.f32 %v1620_v58, %v1678_v54  ;;  %v667_v55 = vmul.f32 %v1629_v2, %v1699_v23 }
 0x107   : > { %v863_v41 = vsel %vm861_vm4, %v854_v1, %v858_v6  ;;  %v867_v13 = vsel %vm861_vm4, %v858_v6, %v854_v1  ;;  %v718_v14 = vmul.f32 %v1625_v62, %v1678_v54  ;;  %v730_v50 = vmul.f32 %v1631_v3, %v1699_v23 }
 0x108   : > { %v884_v56 = vadd.f32 %v863_v41, %v793_v29  ;;  %v794_v35 = vadd.f32 %v772_v8, %v703_v27  ;;  %v877_v0 = vsel %vm800_vm5, 0.0, %v867_v13  ;;  %v719_v17 = vmul.f32 %v1625_v62, %v1652_v33 }
 0x109   : > { %v731_v18 = vmul.f32 %v1631_v3, %v1694_v16  ;;  %v738_v20 = vadd.f32 %v730_v50, %v718_v14  ;;  %v750_v26 = vmul.f32 %v1637_v10, %v1763_v47  ;;  %v751_v19 = vmul.f32 %v1637_v10, %v1715_v25 }
 0x10a   : > { %v890_v51 = vmul.f32 0.5, %v882_v30  ;;  %v900_v22 = vmul.f32 0.70710677, %v884_v56  ;;  %v885_v32 = vadd.f32 %v877_v0, %v794_v35  ;;  %v696_v21 = vmul.f32 %v1635_v7, %v1763_v47 }
 0x10b   : > { %v675_v43 = vadd.f32 %v667_v55, %v647_v5  ;;  %v739_v45 = vadd.f32 %v731_v18, %v719_v17  ;;  %v758_v44 = vadd.f32 %v750_v26, %v738_v20  ;;  %v809_v48 = vmul.f32 %v1627_v63, %v1678_v54 }
 0x10c   : > { %1415 = verf.f32 %v900_v22  ;;  %v901_v52 = vmul.f32 0.70710677, %v885_v32  ;;  %v810_v53 = vmul.f32 %v1627_v63, %v1652_v33  ;;  %v821_v10 = vmul.f32 %v1633_v4, %v1699_v23 }
 0x10d   : > { %v759_v30 = vadd.f32 %v751_v19, %v739_v45  ;;  %v764_v28 = vrot.slane %v758_v44, 7  ;;  %v822_v57 = vmul.f32 %v1633_v4, %v1694_v16  ;;  %v841_v59 = vmul.f32 %v1639_v11, %v1763_v47 }
 0x10e   : > { %v892_v60 = vmul.f32 0.5, %v884_v56  ;;  %1417 = verf.f32 %v901_v52  ;;  %v829_v49 = vadd.f32 %v821_v10, %v809_v48  ;;  %v842_v54 = vmul.f32 %v1639_v11, %v1715_v25 }
 0x10f   : > { %v768_v46 = vrot.slane %v759_v30, 7  ;;  %v830_v34 = vadd.f32 %v822_v57, %v810_v53  ;;  %v648_v29 = vmul.f32 %v1620_v58, %v1652_v33  ;;  %v668_v31 = vmul.f32 %v1629_v2, %v1694_v16 }
 0x110   : > { %v1412_v40 = vpop.eup %1411  ;;  %v893_v1 = vmul.f32 0.5, %v885_v32  ;;  %v704_v6 = vadd.f32 %v696_v21, %v675_v43  ;;  %v849_v8 = vadd.f32 %v841_v59, %v829_v49  ;;  %v669_v27 = vmul.f32 %v1629_v2, %v1763_v47 }
 0x111   : > { %v1414_v5 = vpop.eup %1413  ;;  %v915_v55 = vadd.f32 1.0, %v1412_v40  ;;  %v777_v11 = vsel %vm770_vm2, %v768_v46, %v764_v28  ;;  %v850_v41 = vadd.f32 %v842_v54, %v830_v34  ;;  %v676_v13 = vadd.f32 %v668_v31, %v648_v29 }
 0x112   : > { %v914_v14 = vadd.f32 1.0, %v1414_v5  ;;  %v787_v33 = vsel %vm708_vm3, 0.0, %v777_v11  ;;  %v855_v50 = vrot.slane %v849_v8, 1  ;;  %v773_v56 = vsel %vm770_vm2, %v764_v28, %v768_v46 }
 0x113   : > { %v795_v35 = vadd.f32 %v787_v33, %v704_v6  ;;  %v859_v0 = vrot.slane %v850_v41, 1  ;;  %v705_v17 = vadd.f32 %v697_v61, %v676_v13  ;;  %v720_v18 = vmul.f32 %v1625_v62, %v1699_v23 }
 0x114   : > { %v922_v20 = vmul.f32 %v914_v14, %v890_v51  ;;  %v721_v26 = vmul.f32 %v1625_v62, %v1694_v16  ;;  %v732_v19 = vmul.f32 %v1631_v3, %v1763_v47  ;;  %v733_v22 = vmul.f32 %v1631_v3, %v1715_v25 }
 0x115   : > { %v923_v32 = vmul.f32 %v915_v55, %v891_v9  ;;  %v864_v21 = vsel %vm861_vm4, %v855_v50, %v859_v0  ;;  %v796_v43 = vadd.f32 %v773_v56, %v705_v17  ;;  %v868_v61 = vsel %vm861_vm4, %v859_v0, %v855_v50 }
 0x116   : > { %1303 = vmatprep.mubr.f32.mxu0 %v922_v20  ;;  %v886_v45 = vadd.f32 %v864_v21, %v795_v35  ;;  %v879_v51 = vsel %vm800_vm5, 0.0, %v868_v61  ;;  %v649_v62 = vmul.f32 %v1620_v58, %v1699_v23  ;;  %v740_v44 = vadd.f32 %v732_v19, %v720_v18 }
 0x117   : > { %1304 = vmatmul.mubr.f32.vlgmr.msra.gmra.mxu0 %v923_v32  ;;  %v887_v48 = vadd.f32 %v879_v51, %v796_v43  ;;  %v741_v3 = vadd.f32 %v733_v22, %v721_v26  ;;  %v811_v9 = vmul.f32 %v1627_v63, %v1699_v23  ;;  %v823_v52 = vmul.f32 %v1633_v4, %v1763_v47 }
 0x118   : > { %v902_v53 = vmul.f32 0.70710677, %v886_v45  ;;  %v760_v10 = vadd.f32 %v1718_v42, %v740_v44  ;;  %v812_v30 = vmul.f32 %v1627_v63, %v1694_v16  ;;  %v824_v28 = vmul.f32 %v1633_v4, %v1715_v25 }
 0x119   : > { %v1416_v57 = vpop.eup %1415  ;;  %v903_v59 = vmul.f32 0.70710677, %v887_v48  ;;  %v677_v49 = vadd.f32 %v669_v27, %v649_v62  ;;  %v761_v54 = vadd.f32 %v1706_v36, %v741_v3  ;;  %v831_v46 = vadd.f32 %v823_v52, %v811_v9 }
 0x11a   : > { %v916_v34 = vadd.f32 1.0, %v1416_v57  ;;  %1419 = verf.f32 %v902_v53  ;;  %v765_v23 = vrot.slane %v760_v10, 7  ;;  %v832_v29 = vadd.f32 %v824_v28, %v812_v30 }
 0x11b   : > { %v1418_v47 = vpop.eup %1417  ;;  %1421 = verf.f32 %v903_v59  ;;  %v769_v31 = vrot.slane %v761_v54, 7  ;;  %v851_v42 = vadd.f32 %v1721_v39, %v831_v46  ;;  %v650_v63 = vmul.f32 %v1620_v58, %v1694_v16 }
 0x11c   : > { %v924_v40 = vmul.f32 %v916_v34, %v892_v60  ;;  %v917_v4 = vadd.f32 1.0, %v1418_v47  ;;  %v852_v6 = vadd.f32 %v1710_v37, %v832_v29  ;;  %v670_v36 = vmul.f32 %v1629_v2, %v1715_v25 }
 0x11d   : > { %v699_v8 = vmul.f32 %v1635_v7, %v1692_v15  ;;  %v706_v27 = vadd.f32 %v1713_v24, %v677_v49  ;;  %v778_v5 = vsel %vm770_vm2, %v769_v31, %v765_v23  ;;  %v856_v55 = vrot.slane %v851_v42, 1 }
 0x11e   : > { %1306 = vmatprep.mubr.f32.mxu0 %v924_v40  ;;  %v925_v39 = vmul.f32 %v917_v4, %v893_v1  ;;  %v789_v58 = vsel %vm708_vm3, 0.0, %v778_v5  ;;  %v860_v16 = vrot.slane %v852_v6, 1  ;;  %v678_v60 = vadd.f32 %v670_v36, %v650_v63 }
 0x11f   : > { %v797_v37 = vadd.f32 %v789_v58, %v706_v27  ;;  %v774_v2 = vsel %vm770_vm2, %v765_v23, %v769_v31  ;;  %v894_v56 = vmul.f32 0.5, %v886_v45  ;;  %v895_v0 = vmul.f32 0.5, %v887_v48 }
 0x120   : > { %1307 = vmatmul.mubr.f32.gmra.mxu0 %v925_v39  ;;  %v865_v7 = vsel %vm861_vm4, %v856_v55, %v860_v16  ;;  %v707_v15 = vadd.f32 %v699_v8, %v678_v60  ;;  %v869_v24 = vsel %vm861_vm4, %v860_v16, %v856_v55 }
 0x121   : > { %v888_v25 = vadd.f32 %v865_v7, %v797_v37  ;;  %v881_v1 = vsel %vm800_vm5, 0.0, %v869_v24 }
 0x122   : > { %v798_v11 = vadd.f32 %v774_v2, %v707_v15 }
 0x123   : > { %v904_v41 = vmul.f32 0.70710677, %v888_v25  ;;  %v896_v12 = vmul.f32 0.5, %v888_v25 }
 0x124   : > { %v889_v13 = vadd.f32 %v881_v1, %v798_v11 }
 0x125   : > { %1423 = verf.f32 %v904_v41 }
 0x126   : > { %v905_v14 = vmul.f32 0.70710677, %v889_v13  ;;  %v897_v32 = vmul.f32 0.5, %v889_v13 }
 0x127   : > { %v1420_v33 = vpop.eup %1419 }
 0x128   : > { %v1422_v50 = vpop.eup %1421  ;;  %v918_v35 = vadd.f32 1.0, %v1420_v33  ;;  %1425 = verf.f32 %v905_v14 }
 0x129   : > { %v919_v17 = vadd.f32 1.0, %v1422_v50 }
 0x12a   : > { %v926_v18 = vmul.f32 %v918_v35, %v894_v56 }
 0x12b   : > { %v927_v38 = vmul.f32 %v919_v17, %v895_v0 }
 0x12c   : > { %1309 = vmatprep.mubr.f32.mxu1 %v926_v18 }
 0x12d   : > { %1310 = vmatmul.mubr.f32.vlgmr.msra.gmra.mxu1 %v927_v38 }
 0x132   : > { %v1424_v20 = vpop.eup %1423 }
 0x133   : > { %v920_v26 = vadd.f32 1.0, %v1424_v20 }
 0x135   : > { %v1426_v19 = vpop.eup %1425  ;;  %v928_v22 = vmul.f32 %v920_v26, %v896_v12 }
 0x136   : > { %v921_v21 = vadd.f32 1.0, %v1426_v19 }
 0x137   : > { %1312 = vmatprep.mubr.f32.mxu1 %v928_v22 }
 0x138   : > { %v929_v43 = vmul.f32 %v921_v21, %v897_v32 }
 0x13a   : > { %1313 = vmatmul.mubr.f32.gmra.mxu1 %v929_v43 }
 0x1d7   : > { %v1305_v61 = vpop.f32.mrf.mxu0 }
 0x1d8   : > { %1052 = vst.msk [vmem:[%s301_s28 + $0x8] sm:$0xff] %vm312_vm1, %v1305_v61 }
 0x1d9   : > { %v1012_v45 = vpop.f32.mrf.mxu0 }
 0x1da   : > { %1051 = vst.msk [vmem:[%s301_s28] sm:$0xff] %vm312_vm1, %v1012_v45 }
 0x1e0   : > { %v1308_v51 = vpop.f32.mrf.mxu0 }
 0x1e1   : > { %1054 = vst.msk [vmem:[%s301_s28 + $0x18] sm:$0xff] %vm312_vm1, %v1308_v51 }
 0x1e2   : > { %v1022_v62 = vpop.f32.mrf.mxu0 }
 0x1e3   : > { %1053 = vst.msk [vmem:[%s301_s28 + $0x10] sm:$0xff] %vm312_vm1, %v1022_v62 }
 0x1ed   : > { %v1311_v44 = vpop.f32.mrf.mxu1 }
 0x1ee   : > { %1056 = vst.msk [vmem:[%s301_s28 + $0x28] sm:$0xff] %vm312_vm1, %v1311_v44 }
 0x1ef   : > { %v1032_v48 = vpop.f32.mrf.mxu1 }
 0x1f0   : > { %1055 = vst.msk [vmem:[%s301_s28 + $0x20] sm:$0xff] %vm312_vm1, %v1032_v48 }
 0x1fa   : > { %v1314_v3 = vpop.f32.mrf.mxu1 }
 0x1fb   : > { %1058 = vst.msk [vmem:[%s301_s28 + $0x38] sm:$0xff] %vm312_vm1, %v1314_v3 }
 0x1fc   : > { %v1042_v9 = vpop.f32.mrf.mxu1 }
 0x1fd   : > { %1057 = vst.msk [vmem:[%s301_s28 + $0x30] sm:$0xff] %vm312_vm1, %v1042_v9 }
 0x1fe PF: > { %s15_s22 = sadd.s32 1, %s1465_s22   ;;  %s1908_s18 = smov %s1457_s20 }
 0x1ff   : > { %p12_p8 = scmp.ge.s32.totalorder %s15_s22, 10   ;;  %s1909_s19 = smov %s1461_s21 }
 0x200   : > { %s1910_s20 = smov %s1913_s23  ;;  %s1911_s21 = smov %s1917_s24 }
 0x201   :  { %14 = sbr.rel (!%p12_p8) target bundleno = 3 (0x3), region = 76 }

</bundles_post_ra>
